<compile_context>
chip_gen: v5e
topology: v5e:2x2
jax: 0.10.0
libtpu: 0.0.40
codegen_flags: <defaults>
</compile_context>

<pallas_src>
import jax
import jax.numpy as jnp
from jax.experimental import pallas as pl
from jax.experimental.pallas import tpu as pltpu


# ---------------- Fused Pallas kernel ----------------------------------------

def fused_gcn_kernel(a_ref, x_ref, p_ref,
                     w1_ref, b1_ref, w2_ref, b2_ref, wl_ref, bl_ref,
                     o_ref):
    # One grid step == P packed problem instances (block-diagonal A_hat / P).
    #   a_ref : [P*N, P*N] bf16, x_ref : [P*N, F] bf16, p_ref : [P*G, P*N] bf16
    #   weights bf16, biases f32.  Intermediates stay in VMEM/vregs.
    a = a_ref[...]

    # Layer 1: relu( (A_hat @ X) @ W1 + b1 ) -- aggregate first since F < H,
    # so the wide [PN,PN] contraction runs at width F instead of H.
    ax = jnp.dot(a, x_ref[...], preferred_element_type=jnp.float32)
    h1 = jnp.dot(ax.astype(jnp.bfloat16), w1_ref[...],
                 preferred_element_type=jnp.float32) + b1_ref[...]
    h1 = jnp.maximum(h1, 0.0)                                   # f32 elementwise

    # Layer 2: relu( A_hat @ (H1 @ W2) + b2 ).
    h1w = jnp.dot(h1.astype(jnp.bfloat16), w2_ref[...],
                  preferred_element_type=jnp.float32)
    h2 = jnp.dot(a, h1w.astype(jnp.bfloat16),
                 preferred_element_type=jnp.float32) + b2_ref[...]
    h2 = jnp.maximum(h2, 0.0)

    # global_mean_pool as a matmul with the block-diag [P*G, P*N] mean matrix,
    # then the Linear head.
    pooled = jnp.dot(p_ref[...], h2.astype(jnp.bfloat16),
                     preferred_element_type=jnp.float32)
    o_ref[...] = jnp.dot(pooled.astype(jnp.bfloat16), wl_ref[...],
                         preferred_element_type=jnp.float32) + bl_ref[...]


# ---------------- Wrapper ------------------------------------------------------

def gcn_regression_forward(a_hat, x, pool_mat, params, *, pack=8):
    """a_hat: [B,N,N] f32, x: [B,N,F] f32, pool_mat: [B,G,N] f32 -> [B,G,out] f32."""
    b, n, f = x.shape
    g = pool_mat.shape[1]
    h = params["w1"].shape[1]
    o = params["w_lin"].shape[1]

    pack = min(pack, b)
    assert b % pack == 0, "batch must be divisible by the packing factor"
    t = b // pack                     # grid length; keep >= 2 for v7x megacore
    pn, pg = pack * n, pack * g       # packed node / graph dims (pn == 128 here)

    # ---- host-side packing: block-diag A_hat / pool, stacked X, bf16 cast ----
    def block_diag(blocks):           # [T, P, r, c] -> [T, P*r, P*c]
        tt, p, r, c = blocks.shape
        out = jnp.zeros((tt, p * r, p * c), blocks.dtype)
        for i in range(p):
            out = out.at[:, i * r:(i + 1) * r, i * c:(i + 1) * c].set(blocks[:, i])
        return out

    a_pk = block_diag(a_hat.reshape(t, pack, n, n)).astype(jnp.bfloat16)
    p_pk = block_diag(pool_mat.reshape(t, pack, g, n)).astype(jnp.bfloat16)
    x_pk = x.reshape(t, pn, f).astype(jnp.bfloat16)

    w1 = params["w1"].astype(jnp.bfloat16)
    w2 = params["w2"].astype(jnp.bfloat16)
    wl = params["w_lin"].astype(jnp.bfloat16)
    b1 = params["b1"].astype(jnp.float32)
    b2 = params["b2"].astype(jnp.float32)
    bl = params["b_lin"].astype(jnp.float32)

    # Advisory cost: per-step data bytes * T + weights/biases once (they are
    # grid-resident since their index_map is constant).
    flops = 2 * b * (n * n * f + n * f * h        # layer 1
                     + n * h * h + n * n * h      # layer 2
                     + g * n * h + g * h * o)     # pool + linear
    data_bytes = 2 * t * (pn * pn + pn * f + pg * pn) + 4 * b * g * o
    weight_bytes = 2 * (f * h + h * h + h * o) + 4 * (h + h + o)
    cost = pl.CostEstimate(flops=flops, transcendentals=0,
                           bytes_accessed=data_bytes + weight_bytes)

    shared = lambda i: (0, 0)  # weights/biases: same block every grid step

    out = pl.pallas_call(
        fused_gcn_kernel,
        out_shape=jax.ShapeDtypeStruct((t, pg, o), jnp.float32),
        grid=(t,),
        in_specs=[
            pl.BlockSpec((None, pn, pn), lambda i: (i, 0, 0)),   # A_hat (block-diag)
            pl.BlockSpec((None, pn, f), lambda i: (i, 0, 0)),    # X (stacked)
            pl.BlockSpec((None, pg, pn), lambda i: (i, 0, 0)),   # P (block-diag)
            pl.BlockSpec((f, h), shared),                        # W1  (bf16)
            pl.BlockSpec((1, h), shared),                        # b1  (f32)
            pl.BlockSpec((h, h), shared),                        # W2  (bf16)
            pl.BlockSpec((1, h), shared),                        # b2  (f32)
            pl.BlockSpec((h, o), shared),                        # W_lin (bf16)
            pl.BlockSpec((1, o), shared),                        # b_lin (f32)
        ],
        out_specs=pl.BlockSpec((None, pg, o), lambda i: (i, 0, 0)),
        compiler_params=pltpu.CompilerParams(
            dimension_semantics=("parallel",)),   # shards steps across TCs on v7x
        cost_estimate=cost,
    )(a_pk, x_pk, p_pk, w1, b1, w2, b2, wl, bl)

    return out.reshape(b, g, o)


# ---------------- Glue (plain JAX): graph preprocessing ------------------------
# TODO(synk): for large sparse graphs, replace the dense A_hat matmul with a
# scalar-prefetched gather/segment-sum formulation instead of scaling this.

def normalized_adjacency(edge_index, num_nodes):
    """Dense D^-1/2 (A + I) D^-1/2 as used by PyG GCNConv (add_self_loops)."""
    src, dst = edge_index[0], edge_index[1]
    a = jnp.zeros((num_nodes, num_nodes), jnp.float32)
    if src.shape[0] > 0:
        a = a.at[src, dst].set(1.0)
    a = a + jnp.eye(num_nodes, dtype=jnp.float32)
    deg = jnp.sum(a, axis=1)
    d_inv_sqrt = jax.lax.rsqrt(jnp.maximum(deg, 1e-12))
    return a * d_inv_sqrt[:, None] * d_inv_sqrt[None, :]


def mean_pool_matrix(batch, num_graphs):
    """[G, N] matrix P with P[g, n] = 1/|graph g| if batch[n] == g."""
    one_hot = (batch[None, :] == jnp.arange(num_graphs)[:, None]).astype(jnp.float32)
    counts = jnp.maximum(one_hot.sum(axis=1, keepdims=True), 1.0)
    return one_hot / counts


# ---------------- Main ----------------------------------------------------------

if __name__ == "__main__":
    # B = 16 problem instances (packed 8 per grid step -> grid=(2,)), each with
    # N = 16 nodes, num_node_features = 8, hidden_channels = 32, 2 graphs per
    # instance, linear output dim = 2.
    B, N, F, H, G, O = 16, 16, 8, 32, 2, 2

    key = jax.random.PRNGKey(0)
    kx, k1, k2, k3, k4 = jax.random.split(key, 5)

    # Node features for each instance.
    x = jax.random.normal(kx, (B, N, F), dtype=jnp.float32)

    # Each instance: two graphs of 8 nodes each, bidirectional chain inside
    # each graph.
    src_list, dst_list = [], []
    for g in range(G):
        base = g * 8
        for i in range(7):
            src_list += [base + i, base + i + 1]
            dst_list += [base + i + 1, base + i]
    edge_index = jnp.array([src_list, dst_list], dtype=jnp.int32)
    batch_vec = jnp.array([0] * 8 + [1] * 8, dtype=jnp.int32)

    a_hat_one = normalized_adjacency(edge_index, N)            # [N, N]
    pool_one = mean_pool_matrix(batch_vec, G)                  # [G, N]
    a_hat = jnp.tile(a_hat_one[None], (B, 1, 1))               # [B, N, N]
    pool_mat = jnp.tile(pool_one[None], (B, 1, 1))             # [B, G, N]

    # Deterministic parameter init (glorot-ish normals; zero conv biases).
    params = {
        "w1": jax.random.normal(k1, (F, H), jnp.float32) * (1.0 / jnp.sqrt(F)),
        "b1": jnp.zeros((1, H), jnp.float32),
        "w2": jax.random.normal(k2, (H, H), jnp.float32) * (1.0 / jnp.sqrt(H)),
        "b2": jnp.zeros((1, H), jnp.float32),
        # torch.nn.Linear(H, 2): weight [2, H] stored transposed as [H, 2]
        "w_lin": jax.random.normal(k3, (H, O), jnp.float32) * (1.0 / jnp.sqrt(H)),
        "b_lin": jax.random.normal(k4, (1, O), jnp.float32) * 0.01,
    }

    out = gcn_regression_forward(a_hat, x, pool_mat, params, pack=8)
    out = jax.block_until_ready(out)

    # Pure-JAX reference (same math and identical bf16 cast points, per
    # instance / unpacked, so block-diagonal packing is also validated).
    w1b = params["w1"].astype(jnp.bfloat16)
    w2b = params["w2"].astype(jnp.bfloat16)
    wlb = params["w_lin"].astype(jnp.bfloat16)

    def ref_one(a, xi, p):
        ab = a.astype(jnp.bfloat16)
        ax = jnp.dot(ab, xi.astype(jnp.bfloat16), preferred_element_type=jnp.float32)
        h1 = jnp.maximum(jnp.dot(ax.astype(jnp.bfloat16), w1b,
                                 preferred_element_type=jnp.float32)
                         + params["b1"], 0.0)
        h1w = jnp.dot(h1.astype(jnp.bfloat16), w2b,
                      preferred_element_type=jnp.float32)
        h2 = jnp.maximum(jnp.dot(ab, h1w.astype(jnp.bfloat16),
                                 preferred_element_type=jnp.float32)
                         + params["b2"], 0.0)
        pooled = jnp.dot(p.astype(jnp.bfloat16), h2.astype(jnp.bfloat16),
                         preferred_element_type=jnp.float32)
        return jnp.dot(pooled.astype(jnp.bfloat16), wlb,
                       preferred_element_type=jnp.float32) + params["b_lin"]

    out_ref = jax.vmap(ref_one)(a_hat, x, pool_mat)

    assert out.shape == (B, G, O)
    assert jnp.allclose(out, out_ref, atol=2e-3, rtol=2e-3)

    print("KERNEL_OK")
</pallas_src>

<mosaic_0001>
module attributes {stable_mosaic.version = 11 : i64} {
  func.func @fused_gcn_kernel(%arg0: i32, %arg1: memref<1x128x128xbf16, #tpu.memory_space<vmem>>, %arg2: memref<1x128x8xbf16, #tpu.memory_space<vmem>>, %arg3: memref<1x16x128xbf16, #tpu.memory_space<vmem>>, %arg4: memref<8x32xbf16, #tpu.memory_space<vmem>>, %arg5: memref<1x32xf32, #tpu.memory_space<vmem>>, %arg6: memref<32x32xbf16, #tpu.memory_space<vmem>>, %arg7: memref<1x32xf32, #tpu.memory_space<vmem>>, %arg8: memref<32x2xbf16, #tpu.memory_space<vmem>>, %arg9: memref<1x2xf32, #tpu.memory_space<vmem>>, %arg10: memref<1x16x2xf32, #tpu.memory_space<vmem>>) attributes {dimension_semantics = [#tpu.dimension_semantics<parallel>], iteration_bounds = array<i64: 2>, scalar_prefetch = 0 : i64, scratch_operands = 0 : i64, tpu.core_type = #tpu.core_type<tc>, window_params = [{transform_indices = @transform_0, window_bounds = array<i64: 1, 128, 128>}, {transform_indices = @transform_1, window_bounds = array<i64: 1, 128, 8>}, {transform_indices = @transform_2, window_bounds = array<i64: 1, 16, 128>}, {pipeline_mode = #tpu.pipeline_mode<synchronous>, transform_indices = @transform_3, window_bounds = array<i64: 8, 32>}, {pipeline_mode = #tpu.pipeline_mode<synchronous>, transform_indices = @transform_4, window_bounds = array<i64: 1, 32>}, {pipeline_mode = #tpu.pipeline_mode<synchronous>, transform_indices = @transform_5, window_bounds = array<i64: 32, 32>}, {pipeline_mode = #tpu.pipeline_mode<synchronous>, transform_indices = @transform_6, window_bounds = array<i64: 1, 32>}, {pipeline_mode = #tpu.pipeline_mode<synchronous>, transform_indices = @transform_7, window_bounds = array<i64: 32, 2>}, {pipeline_mode = #tpu.pipeline_mode<synchronous>, transform_indices = @transform_8, window_bounds = array<i64: 1, 2>}, {transform_indices = @transform_9, window_bounds = array<i64: 1, 16, 2>}]} {
    %c0 = arith.constant 0 : index
    %c0_0 = arith.constant 0 : index
    %c0_1 = arith.constant 0 : index
    %0 = vector.load %arg1[%c0, %c0_0, %c0_1] : memref<1x128x128xbf16, #tpu.memory_space<vmem>>, vector<1x128x128xbf16>
    %1 = vector.shape_cast %0 : vector<1x128x128xbf16> to vector<128x128xbf16>
    %c0_2 = arith.constant 0 : index
    %c0_3 = arith.constant 0 : index
    %c0_4 = arith.constant 0 : index
    %2 = vector.load %arg2[%c0_2, %c0_3, %c0_4] : memref<1x128x8xbf16, #tpu.memory_space<vmem>>, vector<1x128x8xbf16>
    %3 = vector.shape_cast %2 : vector<1x128x8xbf16> to vector<128x8xbf16>
    %cst = arith.constant dense<0.000000e+00> : vector<128x8xf32>
    %4 = tpu.matmul %1, %3, %cst {dimension_numbers = #tpu.dot_dimension_numbers<[1], [0], [0], [1], [0, 0, 1, 1], [], []>} : vector<128x128xbf16>, vector<128x8xbf16>, vector<128x8xf32> -> vector<128x8xf32>
    %5 = arith.truncf %4 : vector<128x8xf32> to vector<128x8xbf16>
    %c0_5 = arith.constant 0 : index
    %c0_6 = arith.constant 0 : index
    %6 = vector.load %arg4[%c0_5, %c0_6] : memref<8x32xbf16, #tpu.memory_space<vmem>>, vector<8x32xbf16>
    %cst_7 = arith.constant dense<0.000000e+00> : vector<128x32xf32>
    %7 = tpu.matmul %5, %6, %cst_7 {dimension_numbers = #tpu.dot_dimension_numbers<[1], [0], [0], [1], [0, 0, 1, 1], [], []>} : vector<128x8xbf16>, vector<8x32xbf16>, vector<128x32xf32> -> vector<128x32xf32>
    %c0_8 = arith.constant 0 : index
    %c0_9 = arith.constant 0 : index
    %8 = vector.load %arg5[%c0_8, %c0_9] : memref<1x32xf32, #tpu.memory_space<vmem>>, vector<1x32xf32>
    %9 = vector.broadcast %8 : vector<1x32xf32> to vector<128x32xf32>
    %10 = arith.addf %7, %9 : vector<128x32xf32>
    %cst_10 = arith.constant 0.000000e+00 : f32
    %11 = vector.broadcast %cst_10 : f32 to vector<128x32xf32>
    %12 = arith.maximumf %10, %11 : vector<128x32xf32>
    %13 = arith.truncf %12 : vector<128x32xf32> to vector<128x32xbf16>
    %c0_11 = arith.constant 0 : index
    %c0_12 = arith.constant 0 : index
    %14 = vector.load %arg6[%c0_11, %c0_12] : memref<32x32xbf16, #tpu.memory_space<vmem>>, vector<32x32xbf16>
    %cst_13 = arith.constant dense<0.000000e+00> : vector<128x32xf32>
    %15 = tpu.matmul %13, %14, %cst_13 {dimension_numbers = #tpu.dot_dimension_numbers<[1], [0], [0], [1], [0, 0, 1, 1], [], []>} : vector<128x32xbf16>, vector<32x32xbf16>, vector<128x32xf32> -> vector<128x32xf32>
    %16 = arith.truncf %15 : vector<128x32xf32> to vector<128x32xbf16>
    %cst_14 = arith.constant dense<0.000000e+00> : vector<128x32xf32>
    %17 = tpu.matmul %1, %16, %cst_14 {dimension_numbers = #tpu.dot_dimension_numbers<[1], [0], [0], [1], [0, 0, 1, 1], [], []>} : vector<128x128xbf16>, vector<128x32xbf16>, vector<128x32xf32> -> vector<128x32xf32>
    %c0_15 = arith.constant 0 : index
    %c0_16 = arith.constant 0 : index
    %18 = vector.load %arg7[%c0_15, %c0_16] : memref<1x32xf32, #tpu.memory_space<vmem>>, vector<1x32xf32>
    %19 = vector.broadcast %18 : vector<1x32xf32> to vector<128x32xf32>
    %20 = arith.addf %17, %19 : vector<128x32xf32>
    %cst_17 = arith.constant 0.000000e+00 : f32
    %21 = vector.broadcast %cst_17 : f32 to vector<128x32xf32>
    %22 = arith.maximumf %20, %21 : vector<128x32xf32>
    %c0_18 = arith.constant 0 : index
    %c0_19 = arith.constant 0 : index
    %c0_20 = arith.constant 0 : index
    %23 = vector.load %arg3[%c0_18, %c0_19, %c0_20] : memref<1x16x128xbf16, #tpu.memory_space<vmem>>, vector<1x16x128xbf16>
    %24 = vector.shape_cast %23 : vector<1x16x128xbf16> to vector<16x128xbf16>
    %25 = arith.truncf %22 : vector<128x32xf32> to vector<128x32xbf16>
    %cst_21 = arith.constant dense<0.000000e+00> : vector<16x32xf32>
    %26 = tpu.matmul %24, %25, %cst_21 {dimension_numbers = #tpu.dot_dimension_numbers<[1], [0], [0], [1], [0, 0, 1, 1], [], []>} : vector<16x128xbf16>, vector<128x32xbf16>, vector<16x32xf32> -> vector<16x32xf32>
    %27 = arith.truncf %26 : vector<16x32xf32> to vector<16x32xbf16>
    %c0_22 = arith.constant 0 : index
    %c0_23 = arith.constant 0 : index
    %28 = vector.load %arg8[%c0_22, %c0_23] : memref<32x2xbf16, #tpu.memory_space<vmem>>, vector<32x2xbf16>
    %cst_24 = arith.constant dense<0.000000e+00> : vector<16x2xf32>
    %29 = tpu.matmul %27, %28, %cst_24 {dimension_numbers = #tpu.dot_dimension_numbers<[1], [0], [0], [1], [0, 0, 1, 1], [], []>} : vector<16x32xbf16>, vector<32x2xbf16>, vector<16x2xf32> -> vector<16x2xf32>
    %c0_25 = arith.constant 0 : index
    %c0_26 = arith.constant 0 : index
    %30 = vector.load %arg9[%c0_25, %c0_26] : memref<1x2xf32, #tpu.memory_space<vmem>>, vector<1x2xf32>
    %31 = vector.broadcast %30 : vector<1x2xf32> to vector<16x2xf32>
    %32 = arith.addf %29, %31 : vector<16x2xf32>
    %c0_27 = arith.constant 0 : index
    %c0_28 = arith.constant 0 : index
    %c0_29 = arith.constant 0 : index
    %33 = vector.load %arg10[%c0_27, %c0_28, %c0_29] : memref<1x16x2xf32, #tpu.memory_space<vmem>>, vector<1x16x2xf32>
    %34 = vector.shape_cast %33 : vector<1x16x2xf32> to vector<16x2xf32>
    %35 = vector.shape_cast %32 : vector<16x2xf32> to vector<1x16x2xf32>
    tpu.vector_store %arg10[%c0_27, %c0_28, %c0_29], %35 {strides = array<i32>} : memref<1x16x2xf32, #tpu.memory_space<vmem>>, vector<1x16x2xf32>,
    return
  }
  func.func @transform_0(%arg0: i32) -> (i32, i32, i32) {
    %c0_i32 = arith.constant 0 : i32
    %c0_i32_0 = arith.constant 0 : i32
    %c0_i32_1 = arith.constant 0 : i32
    return %arg0, %c0_i32, %c0_i32_0 : i32, i32, i32
  }
  func.func @transform_1(%arg0: i32) -> (i32, i32, i32) {
    %c0_i32 = arith.constant 0 : i32
    %c0_i32_0 = arith.constant 0 : i32
    %c0_i32_1 = arith.constant 0 : i32
    return %arg0, %c0_i32, %c0_i32_0 : i32, i32, i32
  }
  func.func @transform_2(%arg0: i32) -> (i32, i32, i32) {
    %c0_i32 = arith.constant 0 : i32
    %c0_i32_0 = arith.constant 0 : i32
    %c0_i32_1 = arith.constant 0 : i32
    return %arg0, %c0_i32, %c0_i32_0 : i32, i32, i32
  }
  func.func @transform_3(%arg0: i32) -> (i32, i32) {
    %c0_i32 = arith.constant 0 : i32
    %c0_i32_0 = arith.constant 0 : i32
    %c0_i32_1 = arith.constant 0 : i32
    return %c0_i32, %c0_i32_0 : i32, i32
  }
  func.func @transform_4(%arg0: i32) -> (i32, i32) {
    %c0_i32 = arith.constant 0 : i32
    %c0_i32_0 = arith.constant 0 : i32
    %c0_i32_1 = arith.constant 0 : i32
    return %c0_i32, %c0_i32_0 : i32, i32
  }
  func.func @transform_5(%arg0: i32) -> (i32, i32) {
    %c0_i32 = arith.constant 0 : i32
    %c0_i32_0 = arith.constant 0 : i32
    %c0_i32_1 = arith.constant 0 : i32
    return %c0_i32, %c0_i32_0 : i32, i32
  }
  func.func @transform_6(%arg0: i32) -> (i32, i32) {
    %c0_i32 = arith.constant 0 : i32
    %c0_i32_0 = arith.constant 0 : i32
    %c0_i32_1 = arith.constant 0 : i32
    return %c0_i32, %c0_i32_0 : i32, i32
  }
  func.func @transform_7(%arg0: i32) -> (i32, i32) {
    %c0_i32 = arith.constant 0 : i32
    %c0_i32_0 = arith.constant 0 : i32
    %c0_i32_1 = arith.constant 0 : i32
    return %c0_i32, %c0_i32_0 : i32, i32
  }
  func.func @transform_8(%arg0: i32) -> (i32, i32) {
    %c0_i32 = arith.constant 0 : i32
    %c0_i32_0 = arith.constant 0 : i32
    %c0_i32_1 = arith.constant 0 : i32
    return %c0_i32, %c0_i32_0 : i32, i32
  }
  func.func @transform_9(%arg0: i32) -> (i32, i32, i32) {
    %c0_i32 = arith.constant 0 : i32
    %c0_i32_0 = arith.constant 0 : i32
    %c0_i32_1 = arith.constant 0 : i32
    return %arg0, %c0_i32, %c0_i32_0 : i32, i32, i32
  }
}

</mosaic_0001>

<bundles_post_ra>
// kernel: tpu_custom_call.1
= control target key start
LH: loop header
LB: loop body
LE: loop exit
PB: predicated region body
PF: predicated region fallthrough
CT: control target
= control target key end

     0   :  { %14 = vsyncpa [#allocation3], 0  ;;  %s1460_s0 = inlined_call_operand.vmem [shape: bf16[2,128,128], index: 0, kind: input, shape index: {}]   ;;  %s1461_s1 = inlined_call_operand.vmem [shape: bf16[2,128,8], index: 1, kind: input, shape index: {}]   ;;  %s1462_s2 = inlined_call_operand.vmem [shape: bf16[2,16,128], index: 2, kind: input, shape index: {}]   ;;  %s1463_s3 = inlined_call_operand.hbm [shape: bf16[8,32], index: 3, kind: input, shape index: {}]   ;;  %s1464_s4 = inlined_call_operand.vmem [shape: f32[1,32], index: 4, kind: input, shape index: {}]   ;;  %s1465_s5 = inlined_call_operand.hbm [shape: bf16[32,32], index: 5, kind: input, shape index: {}]   ;;  %s1466_s6 = inlined_call_operand.vmem [shape: f32[1,32], index: 6, kind: input, shape index: {}]   ;;  %s1467_s7 = inlined_call_operand.vmem [shape: bf16[32,2], index: 7, kind: input, shape index: {}]   ;;  %s1468_s8 = inlined_call_operand.vmem [shape: f32[1,2], index: 8, kind: input, shape index: {}]   ;;  %s1469_s9 = inlined_call_operand.vmem [shape: f32[2,16,2], index: 9, kind: output, shape index: {}]  }
   0x1   :  { %15 = vsyncpa [#allocation5], 0  ;;  %s1346_s30 = smov 0  }
   0x2 LB: > { %s268_s12 = sshll.u32 %s1463_s3, 4  ;;  %s1037_s13 = sadd.s32 4294967295, %s1290_s30   ;;  %s1290_s30 = sphi %s1346_s30, %s21_s30   ;;  %s269_s12 = int_to_ptr.hbm [resolvable:$true] %s268_s12 }
   0x3   : > { %p1039_p0 = scmp.ge.s32.totalorder %s1290_s30, 1  ;;  %p256_p1 = scmp.lt.s32.totalorder %s1290_s30, 3 }
   0x4   : > { %p1197_p2 = scmp.eq.s32.totalorder %s1037_s13, 0  ;;  %s1292_s15 = smov [#allocation2]  }
   0x5   : > { %p1357_p3 = pnand %p1039_p0, %p256_p1  ;;  %s270_s16 = sshll.u32 %s1292_s15, 4  ;;  %s271_s16 = int_to_ptr.vmem [resolvable:$true] %s270_s16 }
   0x6   : > { %s282_s19 = sshll.u32 %s1465_s5, 4  ;;  %s1293_s20 = smov [#allocation4]   ;;  %s283_s19 = int_to_ptr.hbm [resolvable:$true] %s282_s19 }
   0x7   : > { %p1190_p4 = pneg %p1357_p3  ;;  %s284_s21 = sshll.u32 %s1293_s20, 4  ;;  %s285_s21 = int_to_ptr.vmem [resolvable:$true] %s284_s21 }
   0x8   : > { %s1294_s22 = smov 64   ;;  %s1295_s23 = smov 4  }
   0x9   : > { %p1191_p5 = pnand %p1197_p2, %p1190_p4  ;;  %333 = sbr.rel (%p1357_p3) target bundleno = 1183 (0x49f), region = 56 }
   0xb   : > { %1193 = dma.hbm_to_vmem [thread:$0]  (!%p1191_p5), %s269_s12, 64, %s271_s16, [#allocation3]  }
   0xc   : > { %1196 = dma.hbm_to_vmem [thread:$0]  (!%p1191_p5), %s283_s19, 256, %s285_s21, [#allocation5], %s1294_s22, %s1294_s22, %s1295_s23  }
   0xe   : > { %1281 = dma.done.wait (%p1197_p2), [#allocation3], 64  }
   0xf   : > { %1283 = vsyncadd (%p1197_p2), [#allocation3], 4294967232 }
  0x10   : > { %1285 = dma.done.wait (%p1197_p2), [#allocation5], 256  }
  0x11   : > { %1287 = vsyncadd (%p1197_p2), [#allocation5], 4294967040  ;;  %p385_p6 = scmp.lt.s32.totalorder %s1037_s13, 1  ;;  %v591_v15 = vld [vmem:[#allocation2] sm:$0xf]  ;;  %vm621_vm0 = vcmask 1043456  }
  0x12   : > { %v623_v16 = vsel %vm621_vm0, %v591_v15, 0  ;;  %vm596_vm1 = vcmask 64512   ;;  %v1178_v39 = vld [vmem:[#allocation4 + $0x8] sm:$0xff]  ;;  %v1177_v41 = vld [vmem:[#allocation4] sm:$0xff]  ;;  %v1213_v45 = vld [vmem:[%s1464_s4] ss:$0 sm:$0xff] }
  0x13   : > { %s1472_s13 = smov (!%p385_p6, %s1037_s13), 1  ;;  %632 = vmatpush.bf16.msra.mxu1 %v623_v16  ;;  %745 = vmatpush.bf16.msra.mxu2 %v1178_v39  ;;  %vm714_vm2 = vcmask 261120   ;;  %vm933_vm3 = vcmask 15360  }
  0x14   : > { %s1157_s24 = sshll.u32 %s1472_s13, 6  ;;  %s1159_s20 = sshll.u32 %s1472_s13, 3 }
  0x15   : > { %s394_s27 = scalar_lea.vmem %s1461_s1, %s1157_s24  ;;  %s389_s10 = scalar_lea.vmem %s1460_s0, %s1157_s24 }
  0x16   : > { %v1176_v0 = vld [vmem:[%s394_s27 + $0x38] sm:$0xff]  ;;  %v1175_v1 = vld [vmem:[%s394_s27 + $0x30] sm:$0xff]  ;;  %v1174_v2 = vld [vmem:[%s394_s27 + $0x28] sm:$0xff]  ;;  %s399_s23 = scalar_lea.vmem %s1462_s2, %s1159_s20  ;;  %s1160_s24 = sshll.u32 %s1472_s13, 4 }
  0x17   : > { %534 = vmatpush.bf16.msra.mxu0 %v1176_v0  ;;  %v1173_v3 = vld [vmem:[%s394_s27 + $0x20] sm:$0xff]  ;;  %v1172_v4 = vld [vmem:[%s394_s27 + $0x18] sm:$0xff]  ;;  %v1171_v5 = vld [vmem:[%s394_s27 + $0x10] sm:$0xff]  ;;  %746 = vmatpush.bf16.msra.mxu2 %v1177_v41  ;;  %s404_s29 = scalar_lea.vmem %s1469_s9, %s1160_s24 }
  0x18   : > { %v1170_v6 = vld [vmem:[%s394_s27 + $0x8] sm:$0xff]  ;;  %v1169_v7 = vld [vmem:[%s394_s27] sm:$0xff]  ;;  %v1388_v10 = vld [vmem:[%s389_s10 + $0x10] sm:$0xff] }
  0x19   : > { %v1382_v8 = vld [vmem:[%s389_s10] sm:$0xff]  ;;  %v1385_v9 = vld [vmem:[%s389_s10 + $0x8] sm:$0xff]  ;;  %v1391_v11 = vld [vmem:[%s389_s10 + $0x18] sm:$0xff] }
  0x1a   : > { %v1394_v12 = vld [vmem:[%s389_s10 + $0x20] sm:$0xff]  ;;  %v1397_v13 = vld [vmem:[%s389_s10 + $0x28] sm:$0xff]  ;;  %v1400_v14 = vld [vmem:[%s389_s10 + $0x30] sm:$0xff] }
  0x1b   : > { %535 = vmatpush.bf16.msra.mxu0 %v1175_v1  ;;  %v1403_v17 = vld [vmem:[%s389_s10 + $0x38] sm:$0xff] }
  0x1f   : > { %536 = vmatpush.bf16.msra.mxu0 %v1174_v2 }
  0x23   : > { %537 = vmatpush.bf16.msra.mxu0 %v1173_v3 }
  0x27   : > { %538 = vmatpush.bf16.msra.mxu0 %v1172_v4 }
  0x2b   : > { %539 = vmatpush.bf16.msra.mxu0 %v1171_v5 }
  0x2f   : > { %540 = vmatpush.bf16.msra.mxu0 %v1170_v6 }
  0x33   : > { %541 = vmatpush.bf16.msra.mxu0 %v1169_v7 }
  0x36   : > { %542 = vmatmul.bf16.vlgmr.msra.gmra.mxu0 %v1382_v8 }
  0x46   : > { %547 = vmatmul.bf16.gmra.mxu0 %v1385_v9 }
  0x56   : > { %552 = vmatmul.bf16.gmra.mxu0 %v1388_v10 }
  0x66   : > { %557 = vmatmul.bf16.gmra.mxu0 %v1391_v11 }
  0x76   : > { %562 = vmatmul.bf16.gmra.mxu0 %v1394_v12 }
  0x86   : > { %567 = vmatmul.bf16.gmra.mxu0 %v1397_v13 }
  0x96   : > { %572 = vmatmul.bf16.gmra.mxu0 %v1400_v14 }
  0xa6   : > { %577 = vmatmul.bf16.gmra.mxu0 %v1403_v17 }
  0xb3   : > { %v543_v18 = vpop.f32.mrf.mxu0 }
  0xbb   : > { %v545_v19 = vpop.f32.mrf.mxu0 }
  0xbc   : > { %v583_v20 = vpack.c.bf16 %v545_v19, %v543_v18 }
  0xbe   : > { %1118 = vmatmul.msk.bf16.vlgmr.msra.gmra.mxu1 %vm596_vm1, %v583_v20 }
  0xc3   : > { %v548_v21 = vpop.f32.mrf.mxu0 }
  0xcb   : > { %v550_v22 = vpop.f32.mrf.mxu0 }
  0xcc   : > { %v584_v23 = vpack.c.bf16 %v550_v22, %v548_v21 }
  0xce   : > { %1119 = vmatmul.msk.bf16.gmra.mxu1 %vm596_vm1, %v584_v23 }
  0xd3   : > { %v553_v24 = vpop.f32.mrf.mxu0 }
  0xdb   : > { %v555_v25 = vpop.f32.mrf.mxu0 }
  0xdc   : > { %v585_v26 = vpack.c.bf16 %v555_v25, %v553_v24 }
  0xde   : > { %1120 = vmatmul.msk.bf16.gmra.mxu1 %vm596_vm1, %v585_v26 }
  0xe3   : > { %v558_v27 = vpop.f32.mrf.mxu0 }
  0xeb   : > { %v560_v28 = vpop.f32.mrf.mxu0 }
  0xec   : > { %v586_v29 = vpack.c.bf16 %v560_v28, %v558_v27 }
  0xee   : > { %1121 = vmatmul.msk.bf16.gmra.mxu1 %vm596_vm1, %v586_v29 }
  0xf3   : > { %v563_v30 = vpop.f32.mrf.mxu0 }
  0xfb   : > { %v565_v31 = vpop.f32.mrf.mxu0 }
  0xfc   : > { %v587_v32 = vpack.c.bf16 %v565_v31, %v563_v30 }
  0xfe   : > { %1122 = vmatmul.msk.bf16.gmra.mxu1 %vm596_vm1, %v587_v32 }
 0x103   : > { %v568_v33 = vpop.f32.mrf.mxu0 }
 0x10b   : > { %v570_v34 = vpop.f32.mrf.mxu0 }
 0x10c   : > { %v588_v35 = vpack.c.bf16 %v570_v34, %v568_v33 }
 0x10e   : > { %1123 = vmatmul.msk.bf16.gmra.mxu1 %vm596_vm1, %v588_v35 }
 0x113   : > { %v573_v36 = vpop.f32.mrf.mxu0 }
 0x11b   : > { %v575_v37 = vpop.f32.mrf.mxu0 }
 0x11c   : > { %v589_v38 = vpack.c.bf16 %v575_v37, %v573_v36 }
 0x11e   : > { %1124 = vmatmul.msk.bf16.gmra.mxu1 %vm596_vm1, %v589_v38 }
 0x123   : > { %v578_v40 = vpop.f32.mrf.mxu0 }
 0x12b   : > { %v580_v42 = vpop.f32.mrf.mxu0 }
 0x12c   : > { %v590_v43 = vpack.c.bf16 %v580_v42, %v578_v40 }
 0x12e   : > { %1125 = vmatmul.msk.bf16.gmra.mxu1 %vm596_vm1, %v590_v43 }
 0x13b   : > { %v634_v44 = vpop.f32.mrf.mxu1 }
 0x13c   : > { %v635_v46 = vadd.f32 %v1213_v45, %v634_v44 }
 0x13e   : > { %v674_v49 = vmax.f32 %v635_v46, 0.0 }
 0x143   : > { %v636_v47 = vpop.f32.mrf.mxu1 }
 0x144   : > { %v637_v48 = vadd.f32 %v1213_v45, %v636_v47 }
 0x146   : > { %v675_v50 = vmax.f32 %v637_v48, 0.0 }
 0x148   : > { %v690_v51 = vpack.c.bf16 %v675_v50, %v674_v49 }
 0x14a   : > { %1134 = vmatmul.msk.bf16.vlgmr.msra.gmra.mxu2 %vm714_vm2, %v690_v51 }
 0x14b   : > { %v639_v52 = vpop.f32.mrf.mxu1 }
 0x14c   : > { %v640_v53 = vadd.f32 %v1213_v45, %v639_v52 }
 0x14e   : > { %v676_v56 = vmax.f32 %v640_v53, 0.0 }
 0x153   : > { %v641_v54 = vpop.f32.mrf.mxu1 }
 0x154   : > { %v642_v55 = vadd.f32 %v1213_v45, %v641_v54 }
 0x156   : > { %v677_v57 = vmax.f32 %v642_v55, 0.0 }
 0x158   : > { %v691_v58 = vpack.c.bf16 %v677_v57, %v676_v56 }
 0x15a   : > { %1135 = vmatmul.msk.bf16.gmra.mxu2 %vm714_vm2, %v691_v58 }
 0x15b   : > { %v644_v59 = vpop.f32.mrf.mxu1 }
 0x15c   : > { %v645_v60 = vadd.f32 %v1213_v45, %v644_v59 }
 0x15e   : > { %v678_v63 = vmax.f32 %v645_v60, 0.0 }
 0x163   : > { %v646_v61 = vpop.f32.mrf.mxu1 }
 0x164   : > { %v647_v62 = vadd.f32 %v1213_v45, %v646_v61 }
 0x166   : > { %v679_v0 = vmax.f32 %v647_v62, 0.0 }
 0x168   : > { %v692_v1 = vpack.c.bf16 %v679_v0, %v678_v63 }
 0x16a   : > { %1136 = vmatmul.msk.bf16.gmra.mxu2 %vm714_vm2, %v692_v1 }
 0x16b   : > { %v649_v2 = vpop.f32.mrf.mxu1 }
 0x16c   : > { %v650_v3 = vadd.f32 %v1213_v45, %v649_v2 }
 0x16e   : > { %v680_v6 = vmax.f32 %v650_v3, 0.0 }
 0x173   : > { %v651_v4 = vpop.f32.mrf.mxu1 }
 0x174   : > { %v652_v5 = vadd.f32 %v1213_v45, %v651_v4 }
 0x176   : > { %v681_v7 = vmax.f32 %v652_v5, 0.0 }
 0x178   : > { %v693_v15 = vpack.c.bf16 %v681_v7, %v680_v6  ;;  %v1214_v6 = vld [vmem:[%s1466_s6] ss:$0 sm:$0xff] }
 0x17a   : > { %1137 = vmatmul.msk.bf16.gmra.mxu2 %vm714_vm2, %v693_v15 }
 0x17b   : > { %v654_v16 = vpop.f32.mrf.mxu1 }
 0x17c   : > { %v655_v18 = vadd.f32 %v1213_v45, %v654_v16 }
 0x17e   : > { %v682_v21 = vmax.f32 %v655_v18, 0.0 }
 0x183   : > { %v656_v19 = vpop.f32.mrf.mxu1 }
 0x184   : > { %v657_v20 = vadd.f32 %v1213_v45, %v656_v19 }
 0x186   : > { %v683_v22 = vmax.f32 %v657_v20, 0.0 }
 0x188   : > { %v694_v23 = vpack.c.bf16 %v683_v22, %v682_v21 }
 0x18a   : > { %1138 = vmatmul.msk.bf16.gmra.mxu2 %vm714_vm2, %v694_v23 }
 0x18b   : > { %v659_v24 = vpop.f32.mrf.mxu1 }
 0x18c   : > { %v660_v25 = vadd.f32 %v1213_v45, %v659_v24 }
 0x18e   : > { %v684_v28 = vmax.f32 %v660_v25, 0.0 }
 0x193   : > { %v661_v26 = vpop.f32.mrf.mxu1 }
 0x194   : > { %v662_v27 = vadd.f32 %v1213_v45, %v661_v26 }
 0x196   : > { %v685_v29 = vmax.f32 %v662_v27, 0.0 }
 0x198   : > { %v695_v30 = vpack.c.bf16 %v685_v29, %v684_v28 }
 0x19a   : > { %1139 = vmatmul.msk.bf16.gmra.mxu2 %vm714_vm2, %v695_v30 }
 0x19b   : > { %v664_v31 = vpop.f32.mrf.mxu1 }
 0x19c   : > { %v665_v32 = vadd.f32 %v1213_v45, %v664_v31 }
 0x19e   : > { %v686_v35 = vmax.f32 %v665_v32, 0.0 }
 0x1a3   : > { %v666_v33 = vpop.f32.mrf.mxu1 }
 0x1a4   : > { %v667_v34 = vadd.f32 %v1213_v45, %v666_v33 }
 0x1a6   : > { %v687_v36 = vmax.f32 %v667_v34, 0.0 }
 0x1a8   : > { %v696_v37 = vpack.c.bf16 %v687_v36, %v686_v35 }
 0x1aa   : > { %1140 = vmatmul.msk.bf16.gmra.mxu2 %vm714_vm2, %v696_v37 }
 0x1ab   : > { %v669_v38 = vpop.f32.mrf.mxu1 }
 0x1ac   : > { %v670_v39 = vadd.f32 %v1213_v45, %v669_v38 }
 0x1ae   : > { %v688_v42 = vmax.f32 %v670_v39, 0.0 }
 0x1b3   : > { %v671_v40 = vpop.f32.mrf.mxu1 }
 0x1b4   : > { %v672_v41 = vadd.f32 %v1213_v45, %v671_v40 }
 0x1b6   : > { %v689_v43 = vmax.f32 %v672_v41, 0.0 }
 0x1b8   : > { %v697_v44 = vpack.c.bf16 %v689_v43, %v688_v42 }
 0x1ba   : > { %1141 = vmatmul.msk.bf16.gmra.mxu2 %vm714_vm2, %v697_v44 }
 0x1cd   : > { %v748_v46 = vpop.f32.mrf.mxu2 }
 0x1d5   : > { %v750_v47 = vpop.f32.mrf.mxu2 }
 0x1d6   : > { %v788_v48 = vpack.c.bf16 %v750_v47, %v748_v46 }
 0x1dd   : > { %v753_v49 = vpop.f32.mrf.mxu2 }
 0x1e5   : > { %v755_v50 = vpop.f32.mrf.mxu2 }
 0x1e6   : > { %v789_v51 = vpack.c.bf16 %v755_v50, %v753_v49 }
 0x1ed   : > { %v758_v52 = vpop.f32.mrf.mxu2 }
 0x1f5   : > { %v760_v53 = vpop.f32.mrf.mxu2 }
 0x1f6   : > { %v790_v54 = vpack.c.bf16 %v760_v53, %v758_v52  ;;  %v1181_v52 = vld [vmem:[%s1467_s7 + $0x8] sm:$0xff] }
 0x1f7   : > { %925 = vmatpush.bf16.msrb.mxu2 %v1181_v52 }
 0x1fd   : > { %v763_v55 = vpop.f32.mrf.mxu2 }
 0x205   : > { %v765_v56 = vpop.f32.mrf.mxu2 }
 0x206   : > { %v791_v57 = vpack.c.bf16 %v765_v56, %v763_v55  ;;  %v1180_v55 = vld [vmem:[%s1467_s7] sm:$0xff] }
 0x207   : > { %926 = vmatpush.bf16.msrb.mxu2 %v1180_v55 }
 0x20d   : > { %v768_v58 = vpop.f32.mrf.mxu2 }
 0x215   : > { %v770_v59 = vpop.f32.mrf.mxu2 }
 0x216   : > { %v792_v4 = vpack.c.bf16 %v770_v59, %v768_v58 }
 0x21d   : > { %v773_v45 = vpop.f32.mrf.mxu2 }
 0x225   : > { %v775_v60 = vpop.f32.mrf.mxu2 }
 0x226   : > { %v793_v3 = vpack.c.bf16 %v775_v60, %v773_v45 }
 0x22d   : > { %v778_v61 = vpop.f32.mrf.mxu2 }
 0x235   : > { %v780_v62 = vpop.f32.mrf.mxu2 }
 0x236   : > { %v794_v2 = vpack.c.bf16 %v780_v62, %v778_v61 }
 0x23d   : > { %v783_v63 = vpop.f32.mrf.mxu2 }
 0x245   : > { %v785_v0 = vpop.f32.mrf.mxu2 }
 0x246   : > { %v795_v1 = vpack.c.bf16 %v785_v0, %v783_v63  ;;  %v1179_v0 = vld [vmem:[%s399_s23] sm:$0xff] }
 0x248   : > { %800 = vmatpush.bf16.msra.mxu3 %v795_v1 }
 0x24c   : > { %801 = vmatpush.bf16.msra.mxu3 %v794_v2 }
 0x250   : > { %802 = vmatpush.bf16.msra.mxu3 %v793_v3 }
 0x254   : > { %803 = vmatpush.bf16.msra.mxu3 %v792_v4  ;;  %v1215_v4 = vld [vmem:[%s1468_s8] ss:$0 sm:$0xff] }
 0x258   : > { %804 = vmatpush.bf16.msra.mxu3 %v791_v57 }
 0x25c   : > { %805 = vmatpush.bf16.msra.mxu3 %v790_v54 }
 0x260   : > { %806 = vmatpush.bf16.msra.mxu3 %v789_v51 }
 0x264   : > { %807 = vmatpush.bf16.msra.mxu3 %v788_v48 }
 0x267   : > { %808 = vmatmul.bf16.vlgmr.msra.gmra.mxu3 %v1382_v8 }
 0x277   : > { %813 = vmatmul.bf16.gmra.mxu3 %v1385_v9 }
 0x287   : > { %818 = vmatmul.bf16.gmra.mxu3 %v1388_v10 }
 0x297   : > { %823 = vmatmul.bf16.gmra.mxu3 %v1391_v11 }
 0x2a7   : > { %828 = vmatmul.bf16.gmra.mxu3 %v1394_v12 }
 0x2b7   : > { %833 = vmatmul.bf16.gmra.mxu3 %v1397_v13 }
 0x2c7   : > { %838 = vmatmul.bf16.gmra.mxu3 %v1400_v14 }
 0x2d7   : > { %843 = vmatmul.bf16.gmra.mxu3 %v1403_v17 }
 0x2ea   : > { %v809_v5 = vpop.f32.mrf.mxu3 }
 0x2eb   : > { %v810_v8 = vadd.f32 %v1214_v6, %v809_v5 }
 0x2ed   : > { %v849_v15 = vmax.f32 %v810_v8, 0.0 }
 0x2f2   : > { %v811_v7 = vpop.f32.mrf.mxu3 }
 0x2f3   : > { %v812_v9 = vadd.f32 %v1214_v6, %v811_v7 }
 0x2f5   : > { %v850_v10 = vmax.f32 %v812_v9, 0.0 }
 0x2f7   : > { %v1436_v16 = vpack.c.bf16 %v850_v10, %v849_v15 }
 0x2fa   : > { %v814_v11 = vpop.f32.mrf.mxu3 }
 0x2fb   : > { %v815_v12 = vadd.f32 %v1214_v6, %v814_v11 }
 0x2fd   : > { %v851_v19 = vmax.f32 %v815_v12, 0.0 }
 0x302   : > { %v816_v18 = vpop.f32.mrf.mxu3 }
 0x303   : > { %v817_v13 = vadd.f32 %v1214_v6, %v816_v18 }
 0x305   : > { %v852_v14 = vmax.f32 %v817_v13, 0.0 }
 0x307   : > { %v868_v20 = vpack.c.bf16 %v852_v14, %v851_v19 }
 0x30a   : > { %v819_v17 = vpop.f32.mrf.mxu3 }
 0x30b   : > { %v820_v21 = vadd.f32 %v1214_v6, %v819_v17 }
 0x30d   : > { %v853_v24 = vmax.f32 %v820_v21, 0.0 }
 0x312   : > { %v821_v22 = vpop.f32.mrf.mxu3 }
 0x313   : > { %v822_v23 = vadd.f32 %v1214_v6, %v821_v22 }
 0x315   : > { %v854_v25 = vmax.f32 %v822_v23, 0.0 }
 0x317   : > { %v869_v26 = vpack.c.bf16 %v854_v25, %v853_v24 }
 0x31a   : > { %v824_v27 = vpop.f32.mrf.mxu3 }
 0x31b   : > { %v825_v28 = vadd.f32 %v1214_v6, %v824_v27 }
 0x31d   : > { %v855_v31 = vmax.f32 %v825_v28, 0.0 }
 0x322   : > { %v826_v29 = vpop.f32.mrf.mxu3 }
 0x323   : > { %v827_v30 = vadd.f32 %v1214_v6, %v826_v29 }
 0x325   : > { %v856_v32 = vmax.f32 %v827_v30, 0.0 }
 0x327   : > { %v870_v33 = vpack.c.bf16 %v856_v32, %v855_v31 }
 0x32a   : > { %v829_v34 = vpop.f32.mrf.mxu3 }
 0x32b   : > { %v830_v59 = vadd.f32 %v1214_v6, %v829_v34 }
 0x32d   : > { %v857_v62 = vmax.f32 %v830_v59, 0.0 }
 0x332   : > { %v831_v35 = vpop.f32.mrf.mxu3 }
 0x333   : > { %v832_v56 = vadd.f32 %v1214_v6, %v831_v35 }
 0x335   : > { %v858_v60 = vmax.f32 %v832_v56, 0.0 }
 0x337   : > { %v871_v63 = vpack.c.bf16 %v858_v60, %v857_v62 }
 0x33a   : > { %v834_v36 = vpop.f32.mrf.mxu3 }
 0x33b   : > { %v835_v53 = vadd.f32 %v1214_v6, %v834_v36 }
 0x33d   : > { %v859_v45 = vmax.f32 %v835_v53, 0.0 }
 0x342   : > { %v836_v37 = vpop.f32.mrf.mxu3 }
 0x343   : > { %v837_v49 = vadd.f32 %v1214_v6, %v836_v37 }
 0x345   : > { %v860_v57 = vmax.f32 %v837_v49, 0.0 }
 0x347   : > { %v872_v61 = vpack.c.bf16 %v860_v57, %v859_v45 }
 0x34a   : > { %v839_v38 = vpop.f32.mrf.mxu3 }
 0x34b   : > { %v840_v46 = vadd.f32 %v1214_v6, %v839_v38 }
 0x34d   : > { %v861_v54 = vmax.f32 %v840_v46, 0.0 }
 0x352   : > { %v841_v39 = vpop.f32.mrf.mxu3 }
 0x353   : > { %v842_v43 = vadd.f32 %v1214_v6, %v841_v39 }
 0x355   : > { %v862_v50 = vmax.f32 %v842_v43, 0.0 }
 0x357   : > { %v873_v58 = vpack.c.bf16 %v862_v50, %v861_v54 }
 0x35a   : > { %v844_v40 = vpop.f32.mrf.mxu3 }
 0x35b   : > { %v845_v41 = vadd.f32 %v1214_v6, %v844_v40 }
 0x35d   : > { %v863_v47 = vmax.f32 %v845_v41, 0.0 }
 0x362   : > { %v846_v42 = vpop.f32.mrf.mxu3 }
 0x363   : > { %v847_v44 = vadd.f32 %v1214_v6, %v846_v42 }
 0x365   : > { %v864_v48 = vmax.f32 %v847_v44, 0.0 }
 0x367   : > { %v874_v51 = vpack.c.bf16 %v864_v48, %v863_v47 }
 0x369   : > { %881 = vmatpush.bf16.msrb.mxu1 %v874_v51 }
 0x36d   : > { %882 = vmatpush.bf16.msrb.mxu1 %v873_v58 }
 0x371   : > { %883 = vmatpush.bf16.msrb.mxu1 %v872_v61 }
 0x375   : > { %884 = vmatpush.bf16.msrb.mxu1 %v871_v63 }
 0x379   : > { %885 = vmatpush.bf16.msrb.mxu1 %v870_v33 }
 0x37d   : > { %886 = vmatpush.bf16.msrb.mxu1 %v869_v26 }
 0x381   : > { %887 = vmatpush.bf16.msrb.mxu1 %v868_v20 }
 0x385   : > { %888 = vmatpush.bf16.msrb.mxu1 %v1436_v16 }
 0x388   : > { %889 = vmatmul.bf16.vlgmr.msrb.gmra.mxu1 %v1179_v0 }
 0x405   : > { %v890_v1 = vpop.f32.mrf.mxu1 }
 0x40d   : > { %v892_v2 = vpop.f32.mrf.mxu1 }
 0x40e   : > { %v895_v3 = vpack.c.bf16 %v892_v2, %v890_v1 }
 0x410   : > { %1154 = vmatmul.msk.bf16.vlgmr.msrb.gmra.mxu2 %vm714_vm2, %v895_v3 }
 0x493   : > { %v928_v5 = vpop.f32.mrf.mxu2 }
 0x494   : > { %v929_v6 = vadd.f32 %v1215_v4, %v928_v5 }
 0x496   : > { %934 = vst.msk [vmem:[%s404_s29] sm:$0xff] %vm933_vm3, %v929_v6 }
 0x49b   : > { %v930_v8 = vpop.f32.mrf.mxu2 }
 0x49c   : > { %v931_v7 = vadd.f32 %v1215_v4, %v930_v8 }
 0x49e   : > { %935 = vst.msk [vmem:[%s404_s29 + $0x8] sm:$0xff] %vm933_vm3, %v931_v7 }
 0x49f PF: > { %s21_s30 = sadd.s32 1, %s1290_s30  }
 0x4a0   : > { %p18_p7 = scmp.ge.s32.totalorder %s21_s30, 4  }
 0x4a2   :  { %20 = sbr.rel (!%p18_p7) target bundleno = 2 (0x2), region = 101 }
 0x4a7   :  { %957 = vsyncpa [#allocation3], 1 }
 0x4a8   :  { %959 = vsyncpa [#allocation3 + $0x1], 1 }
 0x4a9   :  { %960 = vsyncpa [#allocation5], 1 }

</bundles_post_ra>
